<compile_context>
chip_gen: v7x
topology: tpu7x:2x2x1
jax: 0.10.0
libtpu: 0.0.40
codegen_flags: <defaults>
</compile_context>

<pallas_src>
import jax
import jax.numpy as jnp
from jax.experimental import pallas as pl
from jax.experimental.pallas import tpu as pltpu

LANE = 128
SUBLANE = 8


def _round_up(x, m):
    return (x + m - 1) // m * m


def _largest_aligned_divisor(n, max_tile, align):
    """Largest t <= max_tile with t % align == 0 and n % t == 0, else None."""
    best = None
    t = align
    lim = min(n, max_tile)
    while t <= lim:
        if n % t == 0:
            best = t
        t += align
    return best


def _chip_params():
    """Generation-aware VMEM budget / TC count / preferred batch tile."""
    device_kind = ""
    try:
        device_kind = jax.devices()[0].device_kind.lower()
    except Exception:
        pass
    vmem_cap = None
    try:
        info = pltpu.get_tpu_info()
        vmem_cap = int(getattr(info, "vmem_capacity_bytes", 0)) or None
    except Exception:
        vmem_cap = None

    is_v7 = ("v7" in device_kind) or ("7x" in device_kind)
    is_v5e = ("v5e" in device_kind) or ("v5 lite" in device_kind) or ("v5lite" in device_kind)
    if vmem_cap is None:
        vmem_cap = (64 << 20) if is_v7 else (128 << 20)

    num_tc = 2 if is_v7 else 1
    small_vmem = vmem_cap <= (64 << 20)
    # Double-buffered working-set budget and hard cap for vmem_limit_bytes.
    work_budget = (24 << 20) if small_vmem else (64 << 20)
    limit_cap = (52 << 20) if small_vmem else (100 << 20)
    limit_cap = min(limit_cap, int(vmem_cap * 0.8))
    tb_pref = 128 if is_v5e else 256
    return work_budget, limit_cap, num_tc, tb_pref


def _make_kernel(has_bias, multi_k, use_scratch):
    """Build the ensemble-FC kernel; all variants are static (Python) flags."""

    def kernel(x_ref, w_ref, *rest):
        rest = list(rest)
        b_ref = rest.pop(0) if has_bias else None
        o_ref = rest.pop(0)
        acc_ref = rest.pop(0) if use_scratch else None

        # Batched (over the blocked ensemble members) MXU matmul, f32 result.
        part = jnp.einsum(
            "ebi,eio->ebo",
            x_ref[...],
            w_ref[...],
            preferred_element_type=jnp.float32,
        )

        if not multi_k:
            # Single reduction step: fuse matmul + bias + store, no pl.when.
            if has_bias:
                part = part + b_ref[...].astype(jnp.float32)
            o_ref[...] = part.astype(o_ref.dtype)
            return

        k = pl.program_id(3)
        last = pl.num_programs(3) - 1

        if use_scratch:
            # Non-f32 output: accumulate in an f32 scratch, cast at the end.
            @pl.when(k == 0)
            def _init():
                acc_ref[...] = part

            @pl.when(k != 0)
            def _acc():
                acc_ref[...] += part

            @pl.when(k == last)
            def _store():
                res = acc_ref[...]
                if has_bias:
                    res = res + b_ref[...].astype(jnp.float32)
                o_ref[...] = res.astype(o_ref.dtype)
        else:
            # f32 output: accumulate directly into the resident output block
            # (its block index is constant across k), bias folded in at k==0.
            if has_bias:
                @pl.when(k == 0)
                def _init_b():
                    o_ref[...] = part + b_ref[...].astype(jnp.float32)
            else:
                @pl.when(k == 0)
                def _init():
                    o_ref[...] = part

            @pl.when(k != 0)
            def _acc():
                o_ref[...] += part

    return kernel


def ensemble_fc(x, weight, bias=None, *, operand_dtype=None):
    """Ensemble fully-connected forward pass.

    Args:
      x:      (E, B, I)
      weight: (E, I, O)
      bias:   (E, O) or None
      operand_dtype: optional dtype (e.g. jnp.bfloat16 — recommended for
        bandwidth-bound deployments) to cast x/weight to before the matmul;
        accumulation stays f32 and the output keeps x's original dtype.
    Returns:
      (E, B, O), same dtype as the input x.
    """
    E, B, I = x.shape
    Ew, Iw, O = weight.shape
    assert (Ew, Iw) == (E, I), "weight shape must be (E, I, O)"
    if bias is not None:
        assert bias.shape == (E, O), "bias shape must be (E, O)"
    out_dtype = x.dtype
    out_is_f32 = jnp.dtype(out_dtype) == jnp.dtype(jnp.float32)
    has_bias = bias is not None

    if operand_dtype is not None:
        x = x.astype(operand_dtype)
        weight = weight.astype(operand_dtype)

    work_budget, limit_cap, num_tc, tb_pref = _chip_params()

    # ---- reduction (I) tile: must divide the (possibly padded) I exactly ----
    I_pad = I
    if I > 2048 and I % LANE == 0:
        tk = _largest_aligned_divisor(I, 2048, LANE)  # >= 128 guaranteed
    elif I > 4096:
        # Rare: huge non-128-aligned reduction dim -> zero-pad once (safe).
        I_pad = _round_up(I, LANE)
        tk = _largest_aligned_divisor(I_pad, 2048, LANE)
    else:
        tk = I  # full-extent block: no pad, single reduction step

    # ---- output-feature (O) tile ---------------------------------------------
    O_pad = O
    if O % LANE == 0:
        to = _largest_aligned_divisor(O, 2048, LANE)
    elif O <= 2048:
        to = O  # full width: masked store beats a weight jnp.pad HBM round trip
    else:
        O_pad = _round_up(O, LANE)
        to = _largest_aligned_divisor(O_pad, 2048, LANE)

    # ---- batch (B) tile --------------------------------------------------------
    tb = B if B <= tb_pref else tb_pref  # tb_pref is a multiple of 8

    # ---- fit the per-member working set into the VMEM budget ------------------
    x_isz = jnp.dtype(x.dtype).itemsize
    w_isz = jnp.dtype(weight.dtype).itemsize
    b_isz = jnp.dtype(bias.dtype).itemsize if has_bias else 0
    o_isz = jnp.dtype(out_dtype).itemsize

    def _needs_scratch(tk_):
        return (I_pad // tk_) > 1 and not out_is_f32

    def _per_member(tb_, tk_, to_):
        x_t = tb_ * tk_ * x_isz
        w_t = tk_ * to_ * w_isz
        b_t = to_ * b_isz
        o_t = tb_ * to_ * o_isz
        a_t = tb_ * to_ * 4 if _needs_scratch(tk_) else 0
        return 2 * (x_t + w_t + b_t + o_t) + a_t

    for _ in range(64):
        if _per_member(tb, tk, to) <= work_budget:
            break
        smaller_tk = (
            _largest_aligned_divisor(I_pad, tk - LANE, LANE) if tk > LANE else None
        )
        if smaller_tk is not None and tk > 512:
            tk = smaller_tk
        elif to >= 2 * LANE and to % LANE == 0:
            to = _round_up(to // 2, LANE)
        elif tb > SUBLANE:
            tb = max(SUBLANE, _round_up(tb // 2, SUBLANE))
        elif smaller_tk is not None:
            tk = smaller_tk
        else:
            break  # smallest tiles; vmem_limit below will cover the real need

    pm = _per_member(tb, tk, to)
    be = int(max(1, min(E, work_budget // max(1, pm))))

    ge = pl.cdiv(E, be)
    gb = pl.cdiv(B, tb)
    go = pl.cdiv(O_pad, to)
    gk = I_pad // tk

    # Only split the ensemble across members when the chip has 2 TensorCores
    # and no other grid axis already provides >= 2 parallel steps.
    if num_tc >= 2 and E >= 2 and ge * gb * go < 2:
        be = max(1, E // 2)
        ge = pl.cdiv(E, be)

    multi_k = gk > 1
    use_scratch = multi_k and not out_is_f32

    # ---- padding (rare; zeros along I don't change the matmul) ---------------
    if I_pad != I:
        x = jnp.pad(x, ((0, 0), (0, 0), (0, I_pad - I)))
        weight = jnp.pad(weight, ((0, 0), (0, I_pad - I), (0, 0)))
    if O_pad != O:
        weight = jnp.pad(weight, ((0, 0), (0, 0), (0, O_pad - O)))
        if has_bias:
            bias = jnp.pad(bias, ((0, 0), (0, O_pad - O)))

    # ---- specs ----------------------------------------------------------------
    if multi_k:
        grid = (ge, gb, go, gk)
        x_spec = pl.BlockSpec((be, tb, tk), lambda e, b, o, k: (e, b, k))
        w_spec = pl.BlockSpec((be, tk, to), lambda e, b, o, k: (e, k, o))
        b_spec = pl.BlockSpec((be, 1, to), lambda e, b, o, k: (e, 0, o))
        o_spec = pl.BlockSpec((be, tb, to), lambda e, b, o, k: (e, b, o))
        semantics = ("parallel", "parallel", "parallel", "arbitrary")
    else:
        grid = (ge, gb, go)
        x_spec = pl.BlockSpec((be, tb, tk), lambda e, b, o: (e, b, 0))
        w_spec = pl.BlockSpec((be, tk, to), lambda e, b, o: (e, 0, o))
        b_spec = pl.BlockSpec((be, 1, to), lambda e, b, o: (e, 0, o))
        o_spec = pl.BlockSpec((be, tb, to), lambda e, b, o: (e, b, o))
        semantics = ("parallel", "parallel", "parallel")

    in_specs = [x_spec, w_spec]
    operands = [x, weight]
    if has_bias:
        in_specs.append(b_spec)
        operands.append(bias.reshape(E, 1, O_pad))

    scratch_shapes = []
    if use_scratch:
        scratch_shapes.append(pltpu.VMEM((be, tb, to), jnp.float32))

    # ---- VMEM limit (never below the real requirement) ------------------------
    vmem_need = be * pm
    vmem_limit = None
    if vmem_need > (12 << 20):
        vmem_limit = int(vmem_need * 5 // 4)
        if limit_cap > vmem_need:
            vmem_limit = min(vmem_limit, limit_cap)

    bytes_accessed = (
        go * E * B * I_pad * x_isz          # x re-streamed per O tile
        + gb * E * I_pad * O_pad * w_isz    # weight re-streamed per B tile
        + (E * O_pad * b_isz if has_bias else 0)
        + E * B * O_pad * o_isz
    )
    cost = pl.CostEstimate(
        flops=2 * E * B * I * O,
        transcendentals=0,
        bytes_accessed=int(bytes_accessed),
    )

    out = pl.pallas_call(
        _make_kernel(has_bias, multi_k, use_scratch),
        out_shape=jax.ShapeDtypeStruct((E, B, O_pad), out_dtype),
        grid_spec=pltpu.PrefetchScalarGridSpec(
            num_scalar_prefetch=0,
            grid=grid,
            in_specs=in_specs,
            out_specs=o_spec,
            scratch_shapes=scratch_shapes,
        ),
        compiler_params=pltpu.CompilerParams(
            dimension_semantics=semantics,
            vmem_limit_bytes=vmem_limit,
        ),
        cost_estimate=cost,
    )(*operands)

    if O_pad != O:
        out = out[..., :O]
    return out


if __name__ == "__main__":
    def ref_fc(x, w, b):
        r = jnp.einsum("ebi,eio->ebo", x, w, precision="highest")
        if b is not None:
            r = r + b[:, None, :]
        return r

    # 1) typical omnisafe-ish small shapes: ensemble=4, batch=8, in=32, out=128
    E, B, I, O = 4, 8, 32, 128
    kx, kw, kb = jax.random.split(jax.random.PRNGKey(0), 3)
    x = jax.random.normal(kx, (E, B, I), dtype=jnp.float32)
    w = jax.random.normal(kw, (E, I, O), dtype=jnp.float32) * 0.05
    b = jax.random.normal(kb, (E, O), dtype=jnp.float32) * 0.1

    out = jax.block_until_ready(ensemble_fc(x, w, b))
    assert out.shape == (E, B, O)
    assert jnp.allclose(out, ref_fc(x, w, b), atol=1e-4, rtol=1e-4)

    # bias-free variant (no zeros tensor streamed)
    out_nb = jax.block_until_ready(ensemble_fc(x, w, None))
    assert jnp.allclose(out_nb, ref_fc(x, w, None), atol=1e-4, rtol=1e-4)

    # 2) non-128-aligned out_features / odd batch: masked-store path, no weight pad
    E2, B2, I2, O2 = 3, 5, 48, 72
    k2x, k2w, k2b = jax.random.split(jax.random.PRNGKey(1), 3)
    x2 = jax.random.normal(k2x, (E2, B2, I2), dtype=jnp.float32)
    w2 = jax.random.normal(k2w, (E2, I2, O2), dtype=jnp.float32) * 0.05
    b2 = jax.random.normal(k2b, (E2, O2), dtype=jnp.float32) * 0.1
    out2 = jax.block_until_ready(ensemble_fc(x2, w2, b2))
    assert out2.shape == (E2, B2, O2)
    assert jnp.allclose(out2, ref_fc(x2, w2, b2), atol=1e-4, rtol=1e-4)

    # 3) large reduction dim: exercises the multi-k direct-accumulation path
    E3, B3, I3, O3 = 2, 8, 2560, 256
    k3x, k3w, k3b = jax.random.split(jax.random.PRNGKey(2), 3)
    x3 = jax.random.normal(k3x, (E3, B3, I3), dtype=jnp.float32)
    w3 = jax.random.normal(k3w, (E3, I3, O3), dtype=jnp.float32) * 0.02
    b3 = jax.random.normal(k3b, (E3, O3), dtype=jnp.float32) * 0.1
    out3 = jax.block_until_ready(ensemble_fc(x3, w3, b3))
    assert out3.shape == (E3, B3, O3)
    assert jnp.allclose(out3, ref_fc(x3, w3, b3), atol=2e-3, rtol=2e-3)

    # 4) bf16 operand stream (recommended for bandwidth-bound deployments)
    out_bf = jax.block_until_ready(ensemble_fc(x, w, b, operand_dtype=jnp.bfloat16))
    assert out_bf.dtype == x.dtype
    assert jnp.allclose(out_bf, ref_fc(x, w, b), atol=5e-2, rtol=5e-2)

    print("KERNEL_OK")
</pallas_src>

<mosaic_0001>
module attributes {stable_mosaic.version = 11 : i64} {
  func.func @kernel(%arg0: i32, %arg1: i32, %arg2: i32, %arg3: memref<4x8x32xf32, #tpu.memory_space<vmem>>, %arg4: memref<4x32x128xf32, #tpu.memory_space<vmem>>, %arg5: memref<4x1x128xf32, #tpu.memory_space<vmem>>, %arg6: memref<4x8x128xf32, #tpu.memory_space<vmem>>) attributes {dimension_semantics = [#tpu.dimension_semantics<parallel>, #tpu.dimension_semantics<parallel>, #tpu.dimension_semantics<parallel>], iteration_bounds = array<i64: 1, 1, 1>, scalar_prefetch = 0 : i64, scratch_operands = 0 : i64, tpu.core_type = #tpu.core_type<tc>, window_params = [{transform_indices = @transform_0, window_bounds = array<i64: 4, 8, 32>}, {transform_indices = @transform_1, window_bounds = array<i64: 4, 32, 128>}, {transform_indices = @transform_2, window_bounds = array<i64: 4, 1, 128>}, {transform_indices = @transform_3, window_bounds = array<i64: 4, 8, 128>}]} {
    %c0 = arith.constant 0 : index
    %c0_0 = arith.constant 0 : index
    %c0_1 = arith.constant 0 : index
    %0 = vector.load %arg3[%c0, %c0_0, %c0_1] : memref<4x8x32xf32, #tpu.memory_space<vmem>>, vector<4x8x32xf32>
    %c0_2 = arith.constant 0 : index
    %c0_3 = arith.constant 0 : index
    %c0_4 = arith.constant 0 : index
    %1 = vector.load %arg4[%c0_2, %c0_3, %c0_4] : memref<4x32x128xf32, #tpu.memory_space<vmem>>, vector<4x32x128xf32>
    "tpu.trace_start"() <{level = 10 : i32, message = "ebi,eio->ebo"}> : () -> ()
    %cst = arith.constant dense<0.000000e+00> : vector<4x8x128xf32>
    %2 = tpu.matmul %0, %1, %cst {dimension_numbers = #tpu.dot_dimension_numbers<[2], [1], [1], [2], [0, 0, 0, 1, 1, 2], [0], [0]>} : vector<4x8x32xf32>, vector<4x32x128xf32>, vector<4x8x128xf32> -> vector<4x8x128xf32>
    "tpu.trace_stop"() : () -> ()
    %c0_5 = arith.constant 0 : index
    %c0_6 = arith.constant 0 : index
    %c0_7 = arith.constant 0 : index
    %3 = vector.load %arg5[%c0_5, %c0_6, %c0_7] : memref<4x1x128xf32, #tpu.memory_space<vmem>>, vector<4x1x128xf32>
    %4 = vector.broadcast %3 : vector<4x1x128xf32> to vector<4x8x128xf32>
    %5 = arith.addf %2, %4 : vector<4x8x128xf32>
    %c0_8 = arith.constant 0 : index
    %c0_9 = arith.constant 0 : index
    %c0_10 = arith.constant 0 : index
    %6 = vector.load %arg6[%c0_8, %c0_9, %c0_10] : memref<4x8x128xf32, #tpu.memory_space<vmem>>, vector<4x8x128xf32>
    tpu.vector_store %arg6[%c0_8, %c0_9, %c0_10], %5 {strides = array<i32>} : memref<4x8x128xf32, #tpu.memory_space<vmem>>, vector<4x8x128xf32>,
    return
  }
  func.func @transform_0(%arg0: i32, %arg1: i32, %arg2: i32) -> (i32, i32, i32) {
    %c0_i32 = arith.constant 0 : i32
    %c0_i32_0 = arith.constant 0 : i32
    return %arg0, %arg1, %c0_i32 : i32, i32, i32
  }
  func.func @transform_1(%arg0: i32, %arg1: i32, %arg2: i32) -> (i32, i32, i32) {
    %c0_i32 = arith.constant 0 : i32
    %c0_i32_0 = arith.constant 0 : i32
    return %arg0, %c0_i32, %arg2 : i32, i32, i32
  }
  func.func @transform_2(%arg0: i32, %arg1: i32, %arg2: i32) -> (i32, i32, i32) {
    %c0_i32 = arith.constant 0 : i32
    %c0_i32_0 = arith.constant 0 : i32
    return %arg0, %c0_i32, %arg2 : i32, i32, i32
  }
  func.func @transform_3(%arg0: i32, %arg1: i32, %arg2: i32) -> (i32, i32, i32) {
    %c0_i32 = arith.constant 0 : i32
    return %arg0, %arg1, %arg2 : i32, i32, i32
  }
}

</mosaic_0001>

<bundles_post_ra>
// kernel: tpu_custom_call.1
= control target key start
LH: loop header
LB: loop body
LE: loop exit
PB: predicated region body
PF: predicated region fallthrough
CT: control target
= control target key end

     0   :  { %8 = vsyncpa [#allocation3], 0  ;;  %s675_s0 = inlined_call_operand.hbm [shape: f32[4,8,32], index: 0, kind: input, shape index: {}]   ;;  %s676_s1 = inlined_call_operand.hbm [shape: f32[4,32,128], index: 1, kind: input, shape index: {}]   ;;  %s677_s2 = inlined_call_operand.vmem [shape: f32[4,1,128], index: 2, kind: input, shape index: {}]   ;;  %s678_s3 = inlined_call_operand.hbm [shape: f32[4,8,128], index: 3, kind: output, shape index: {}]  }
   0x1   :  { %9 = vsyncpa [#allocation6], 0 }
   0x2   :  { %10 = vsyncpa [#allocation4], 0  ;;  %s582_s12 = smov [#allocation2]   ;;  %s510_s16 = scalar_lea.hbm %s675_s0, 512 }
   0x3   :  { %s16_s13 = sshll.u32 %s582_s12, 4  ;;  %p511_p0 = scmp.ne.s32.totalorder %s675_s0, %s510_s16  ;;  %s17_s13 = int_to_ptr.vmem [resolvable:$true] %s16_s13 }
   0x4   :  { %p514_p1 = scmp.lt.u32.totalorder %s510_s16, %s675_s0 }
   0x6   :  { %p516_p2 = pnand %p514_p1, %p511_p0 }
   0x8   :  { %519 = shalt.err (!%p516_p2)
}
   0x9   :  { %s520_s21 = scalar_lea.vmem %s17_s13, 512  ;;  %p525_p4 = scmp.lt.s32.totalorder %s17_s13, %s17_s13 }
   0xa   :  { %p521_p3 = scmp.ne.s32.totalorder %s17_s13, %s520_s21  ;;  %p526_p5 = scmp.lt.s32.totalorder %s520_s21, %s520_s21 }
   0xc   :  { %p527_p6 = por %p526_p5, %p525_p4 }
   0xe   :  { %p528_p7 = pnand %p527_p6, %p521_p3 }
  0x10   :  { %531 = shalt.err (!%p528_p7)
}
  0x11   :  { %s583_s22 = smov 128   ;;  %s584_s23 = smov 8  }
  0x12   :  { %22 = dma.hbm_to_vmem [thread:$0]  %s675_s0, 512, %s17_s13, [#allocation3], %s583_s22, %s583_s22, %s584_s23  }
  0x13   :  { %s585_s26 = smov [#allocation5]   ;;  %s532_s30 = scalar_lea.hbm %s676_s1, 2048 }
  0x14   :  { %s28_s27 = sshll.u32 %s585_s26, 4  ;;  %p533_p8 = scmp.ne.s32.totalorder %s676_s1, %s532_s30  ;;  %s29_s27 = int_to_ptr.vmem [resolvable:$true] %s28_s27 }
  0x15   :  { %p536_p9 = scmp.lt.u32.totalorder %s532_s30, %s676_s1 }
  0x17   :  { %p538_p10 = pnand %p536_p9, %p533_p8 }
  0x19   :  { %541 = shalt.err (!%p538_p10)
}
  0x1a   :  { %s542_s8 = scalar_lea.vmem %s29_s27, 2048  ;;  %p547_p12 = scmp.lt.s32.totalorder %s29_s27, %s29_s27 }
  0x1b   :  { %p543_p11 = scmp.ne.s32.totalorder %s29_s27, %s542_s8  ;;  %p548_p13 = scmp.lt.s32.totalorder %s542_s8, %s542_s8 }
  0x1d   :  { %p549_p0 = por %p548_p13, %p547_p12 }
  0x1f   :  { %p550_p1 = pnand %p549_p0, %p543_p11 }
  0x21   :  { %553 = shalt.err (!%p550_p1)
}
  0x22   :  { %34 = dma.hbm_to_vmem [thread:$0]  %s676_s1, 2048, %s29_s27, [#allocation6], %s583_s22, %s583_s22, %s584_s23  }
  0x23   :  { %576 = dma.done.wait [#allocation3], 512  }
  0x24   :  { %577 = vsyncadd [#allocation3], 4294966784 }
  0x25   :  { %578 = dma.done.wait [#allocation6], 2048  }
  0x26   :  { %579 = vsyncadd [#allocation6], 4294965248  ;;  %v586_v0 = vmov 0.0|0.0   ;;  %vm587_vm0 = vmmov 0   ;;  %v588_v1 = vmov 0.0   ;;  %v47_v2 = vld [vmem:[#allocation5] sm:$0xff] }
  0x27   :  { %478 = vmatprep.subr.bf16.mxu0 %v586_v0  ;;  %484 = vmatprep.subr.bf16.mxu1 %v586_v0  ;;  %v48_v3 = vld [vmem:[#allocation5 + $0x8] sm:$0xff]  ;;  %v51_v4 = vld [vmem:[#allocation5 + $0x20] sm:$0xff]  ;;  %v49_v7 = vld [vmem:[#allocation5 + $0x10] sm:$0xff]  ;;  %vm91_vm1 = vcmask 261120   ;;  %s589_s17 = smov [#allocation7]  }
  0x28   :  { %442 = vmatprep.mubr.msk.f32.mxu0 %vm587_vm0, %v588_v1  ;;  %453 = vmatprep.mubr.msk.f32.mxu1 %vm587_vm0, %v588_v1  ;;  %v479_v5 = vpack.c.bf16 %v48_v3, %v47_v2  ;;  %v52_v6 = vld [vmem:[#allocation5 + $0x28] sm:$0xff]  ;;  %v50_v8 = vld [vmem:[#allocation5 + $0x18] sm:$0xff]  ;;  %v53_v10 = vld [vmem:[#allocation5 + $0x30] sm:$0xff]  ;;  %s393_s18 = sshll.u32 %s589_s17, 4  ;;  %s394_s18 = int_to_ptr.vmem [resolvable:$true] %s393_s18 }
  0x29   :  { %v485_v9 = vpack.c.bf16 %v52_v6, %v51_v4  ;;  %v54_v11 = vld [vmem:[#allocation5 + $0x38] sm:$0xff]  ;;  %v482_v12 = vpack.c.bf16 %v50_v8, %v49_v7  ;;  %v55_v14 = vld [vmem:[#allocation5 + $0x40] sm:$0xff]  ;;  %v56_v15 = vld [vmem:[#allocation5 + $0x48] sm:$0xff]  ;;  %s554_s19 = scalar_lea.vmem %s394_s18, 512  ;;  %p559_p3 = scmp.lt.s32.totalorder %s394_s18, %s394_s18 }
  0x2a   :  { %480 = vmatpush3.bf16.msra.mxu0 %v479_v5  ;;  %v488_v13 = vpack.c.bf16 %v54_v11, %v53_v10  ;;  %v59_v16 = vld [vmem:[#allocation5 + $0x60] sm:$0xff]  ;;  %v60_v17 = vld [vmem:[#allocation5 + $0x68] sm:$0xff]  ;;  %v491_v19 = vpack.c.bf16 %v56_v15, %v55_v14  ;;  %v57_v22 = vld [vmem:[#allocation5 + $0x50] sm:$0xff]  ;;  %p555_p2 = scmp.ne.s32.totalorder %s394_s18, %s554_s19  ;;  %p560_p4 = scmp.lt.s32.totalorder %s554_s19, %s554_s19 }
  0x2b   :  { %486 = vmatpush3.bf16.msra.mxu1 %v485_v9  ;;  %481 = vmatprep.subr.bf16.mxu0 %v586_v0  ;;  %v43_v18 = vld [vmem:[#allocation2] sm:$0xff]  ;;  %v44_v20 = vld [vmem:[#allocation2 + $0x8] sm:$0xff]  ;;  %v497_v21 = vpack.c.bf16 %v60_v17, %v59_v16  ;;  %v58_v23 = vld [vmem:[#allocation5 + $0x58] sm:$0xff] }
  0x2c   :  { %487 = vmatprep.subr.bf16.mxu1 %v586_v0  ;;  %v61_v24 = vld [vmem:[#allocation5 + $0x70] sm:$0xff]  ;;  %v62_v25 = vld [vmem:[#allocation5 + $0x78] sm:$0xff]  ;;  %v494_v26 = vpack.c.bf16 %v58_v23, %v57_v22  ;;  %v406_v30 = vld [vmem:[%s677_s2] ss:$0 sm:$0xff]  ;;  %p561_p5 = por %p560_p4, %p559_p3 }
  0x2d   :  { %v500_v27 = vpack.c.bf16 %v62_v25, %v61_v24  ;;  %v45_v28 = vld [vmem:[#allocation2 + $0x10] sm:$0xff]  ;;  %v46_v29 = vld [vmem:[#allocation2 + $0x18] sm:$0xff]  ;;  %v407_v31 = vld [vmem:[%s677_s2 + $0x1] ss:$0 sm:$0xff] }
  0x2e   :  { %483 = vmatpush3.bf16.msra.mxu0 %v482_v12  ;;  %v408_v38 = vld [vmem:[%s677_s2 + $0x2] ss:$0 sm:$0xff]  ;;  %v409_v39 = vld [vmem:[%s677_s2 + $0x3] ss:$0 sm:$0xff]  ;;  %p562_p6 = pnand %p561_p5, %p555_p2 }
  0x2f   :  { %489 = vmatpush3.bf16.msra.mxu1 %v488_v13  ;;  %490 = vmatprep.subr.bf16.mxu0 %v586_v0 }
  0x30   :  { %496 = vmatprep.subr.bf16.mxu1 %v586_v0 }
  0x31   :  { %443 = vmatmul.mubr.msk.f32.vlgmr.msra.gmra.mrb[0].mxu0 %vm91_vm1, %v43_v18 }
  0x32   :  { %454 = vmatmul.mubr.msk.f32.vlgmr.msra.gmra.mrb[0].mxu1 %vm91_vm1, %v44_v20  ;;  %492 = vmatpush3.bf16.msra.mxu0 %v491_v19 }
  0x33   :  { %498 = vmatpush3.bf16.msra.mxu1 %v497_v21  ;;  %493 = vmatprep.subr.bf16.mxu0 %v586_v0 }
  0x34   :  { %499 = vmatprep.subr.bf16.mxu1 %v586_v0  ;;  %464 = vmatprep.mubr.msk.f32.mxu0 %vm587_vm0, %v588_v1 }
  0x35   :  { %475 = vmatprep.mubr.msk.f32.mxu1 %vm587_vm0, %v588_v1 }
  0x36   :  { %495 = vmatpush3.bf16.msra.mxu0 %v494_v26 }
  0x37   :  { %501 = vmatpush3.bf16.msra.mxu1 %v500_v27 }
  0x39   :  { %465 = vmatmul.mubr.msk.f32.vlgmr.msra.gmra.mrb[2].mxu0 %vm91_vm1, %v45_v28 }
  0x3a   :  { %476 = vmatmul.mubr.msk.f32.vlgmr.msra.gmra.mrb[2].mxu1 %vm91_vm1, %v46_v29 }
 0x104   :  { %v161_v32 = vpop.f32.mrb[0].mxu0 }
 0x105   :  { %v162_v33 = vadd.f32 %v406_v30, %v161_v32  ;;  %v234_v34 = vpop.f32.mrb[0].mxu1  ;;  %v444_v35 = vpop.f32.mrb[1].mxu0 }
 0x106   :  { %v235_v36 = vadd.f32 %v407_v31, %v234_v34  ;;  %v455_v37 = vpop.f32.mrb[1].mxu1 }
 0x107   :  { %384 = vst [vmem:[#allocation7] sm:$0xff] %v162_v33 }
 0x108   :  { %385 = vst [vmem:[#allocation7 + $0x8] sm:$0xff] %v235_v36 }
 0x10c   :  { %v307_v40 = vpop.f32.mrb[2].mxu0 }
 0x10d   :  { %v308_v41 = vadd.f32 %v408_v38, %v307_v40  ;;  %v380_v42 = vpop.f32.mrb[2].mxu1  ;;  %v466_v43 = vpop.f32.mrb[3].mxu0 }
 0x10e   :  { %v381_v44 = vadd.f32 %v409_v39, %v380_v42  ;;  %v477_v45 = vpop.f32.mrb[3].mxu1 }
 0x10f   :  { %386 = vst [vmem:[#allocation7 + $0x10] sm:$0xff] %v308_v41 }
 0x110   :  { %387 = vst [vmem:[#allocation7 + $0x18] sm:$0xff] %v381_v44 }
 0x111   :  { %565 = shalt.err (!%p562_p6)
}
 0x112   :  { %s566_s21 = scalar_lea.hbm %s678_s3, 512 }
 0x113   :  { %p567_p7 = scmp.ne.s32.totalorder %s678_s3, %s566_s21  ;;  %p570_p8 = scmp.lt.u32.totalorder %s566_s21, %s678_s3 }
 0x115   :  { %p572_p9 = pnand %p570_p8, %p567_p7 }
 0x117   :  { %575 = shalt.err (!%p572_p9)
}
 0x118   :  { %399 = dma.vmem_to_hbm [thread:$0]  %s394_s18, 512, %s678_s3, [#allocation4], %s583_s22, %s583_s22, %s584_s23  }
 0x119   :  { %580 = dma.done.wait [#allocation4], 512  }
 0x11a   :  { %581 = vsyncadd [#allocation4], 4294966784 }
 0x11b   :  { %403 = vsyncpa [#allocation3], 1 }
 0x11c   :  { %404 = vsyncpa [#allocation6], 1 }
 0x11d   :  { %405 = vsyncpa [#allocation4], 1 }

</bundles_post_ra>
